<compile_context>
chip_gen: v5e
topology: v5e:2x2
jax: 0.10.0
libtpu: 0.0.40
codegen_flags: <defaults>
</compile_context>

<pallas_src>
import functools

import jax
import jax.numpy as jnp
from jax.experimental import pallas as pl
from jax.experimental.pallas import tpu as pltpu


def _t5_layernorm_kernel(x_ref, w_ref, o_ref, *, eps, cast_to_weight_dtype):
    # x_ref: (block_rows, D)   w_ref: (1, D)   o_ref: (block_rows, D)
    x = x_ref[...].astype(jnp.float32)
    # T5 / RMSNorm: variance = mean(x^2) over the (true, unpadded) hidden dim.
    var = jnp.mean(x * x, axis=-1, keepdims=True)
    inv = jax.lax.rsqrt(var + eps)          # EUP op -> free slot; kernel is HBM-bound
    xn = x * inv
    w = w_ref[...]                          # constant index_map -> stays resident
    if cast_to_weight_dtype:
        # Match PyTorch T5LayerNorm: cast normalized states to half weight dtype
        # BEFORE scaling.
        xn = xn.astype(w.dtype)
    o_ref[...] = (xn * w).astype(o_ref.dtype)


def _tpu_generation_params():
    """Returns (vmem_capacity_bytes, per-tile byte cap, min grid steps)."""
    vmem_bytes = 128 << 20
    try:
        info = pltpu.get_tpu_info()
        vmem_bytes = int(getattr(info, "vmem_capacity_bytes", vmem_bytes))
    except Exception:
        pass
    small_vmem = vmem_bytes <= (64 << 20)        # v7x-like: 64 MiB VMEM, 2 TCs/chip
    tile_cap_bytes = (4 << 20) if small_vmem else (8 << 20)
    # On 2-TC chips keep >= 4 grid steps so each core gets >= 2 (pipelining works).
    min_steps = 4 if small_vmem else 1
    return vmem_bytes, tile_cap_bytes, min_steps


def _pick_block_rows(rows, d, itemsize, out_itemsize, *, tile_cap_bytes, min_steps):
    """Largest sublane-aligned row tile under the (f32-equivalent) byte cap,
    shrunk if needed to give at least `min_steps` grid steps."""
    align = max(8, 32 // max(int(itemsize), 1))   # 8 (f32), 16 (bf16), 32 (int8/fp8)
    # Budget on the f32-equivalent footprint per row: the in-kernel f32
    # intermediates dominate VMEM for sub-32-bit inputs.
    row_bytes = max(d * max(int(itemsize), int(out_itemsize), 4), 1)
    cap = (tile_cap_bytes // row_bytes // align) * align
    cap = max(cap, align)
    if min_steps > 1:
        per_step = -(-rows // min_steps)                       # ceil(rows / min_steps)
        per_step = ((per_step + align - 1) // align) * align   # round UP to alignment
        cap = min(cap, max(per_step, align))
    if cap >= rows:
        return rows          # single full-extent block (always legal, fits the cap)
    return cap


def enc_head_forward(x, weight, *, eps=1e-6, block_rows=None):
    """EncHead.forward: x -> T5LayerNorm(x) with scale `weight`.

    x:      (B, S, D) array (any float dtype)
    weight: (D,) scale parameter
    """
    B, S, D = x.shape
    rows = B * S

    x2d = x.reshape(rows, D)
    w2d = weight.reshape(1, D)

    itemsize = int(jnp.dtype(x.dtype).itemsize)
    w_is_half = jnp.dtype(weight.dtype) in (jnp.dtype(jnp.bfloat16), jnp.dtype(jnp.float16))
    if w_is_half:
        out_dtype = weight.dtype
    else:
        out_dtype = jnp.promote_types(jnp.promote_types(x.dtype, jnp.float32), weight.dtype)
    out_itemsize = int(jnp.dtype(out_dtype).itemsize)

    vmem_cap, tile_cap_bytes, min_steps = _tpu_generation_params()

    if block_rows is None:
        block_rows = _pick_block_rows(
            rows, D, itemsize, out_itemsize,
            tile_cap_bytes=tile_cap_bytes, min_steps=min_steps)
    else:
        align = max(8, 32 // max(itemsize, 1))
        block_rows = min(int(block_rows), rows)
        if block_rows < rows:
            block_rows = max(align, (block_rows // align) * align)
    block_rows = max(1, block_rows)

    grid = (pl.cdiv(rows, block_rows),)   # partial last block handled by Pallas

    # VMEM budget: double-buffered in/out tiles + f32 intermediates + weight + slack,
    # clamped to 3/4 of physical VMEM (48 MiB on v7x, 96 MiB on v5e/v6e).
    in_bytes = block_rows * D * itemsize
    out_bytes = block_rows * D * out_itemsize
    f32_bytes = block_rows * D * 4
    vmem_limit = 2 * in_bytes + 2 * out_bytes + 3 * f32_bytes + D * 8 + (4 << 20)
    vmem_limit = int(min(max(vmem_limit, 16 << 20), (vmem_cap * 3) // 4))

    out2d = pl.pallas_call(
        functools.partial(_t5_layernorm_kernel, eps=float(eps),
                          cast_to_weight_dtype=w_is_half),
        out_shape=jax.ShapeDtypeStruct((rows, D), out_dtype),
        grid_spec=pltpu.PrefetchScalarGridSpec(
            num_scalar_prefetch=0,
            grid=grid,
            in_specs=[
                pl.BlockSpec((block_rows, D), lambda i: (i, 0)),
                pl.BlockSpec((1, D), lambda i: (0, 0)),   # fetched once, stays resident
            ],
            out_specs=pl.BlockSpec((block_rows, D), lambda i: (i, 0)),
        ),
        compiler_params=pltpu.CompilerParams(
            dimension_semantics=("parallel",),
            vmem_limit_bytes=vmem_limit,
        ),
    )(x2d, w2d)

    return out2d.reshape(B, S, D)


if __name__ == "__main__":
    # Config implied by the module: d_model (hidden) and layer_norm_epsilon.
    batch, seq, d_model = 2, 8, 32
    eps = 1e-6

    key = jax.random.PRNGKey(0)
    x = jax.random.normal(key, (batch, seq, d_model), dtype=jnp.float32)

    # _T5LayerNorm.__init__ sets weight = ones(d_model); deterministic in-script init.
    weight = jnp.ones((d_model,), dtype=jnp.float32)

    out = enc_head_forward(x, weight, eps=eps)
    out = jax.block_until_ready(out)

    # Pure-JAX reference check (T5 RMS layer norm).
    xf = x.astype(jnp.float32)
    var = jnp.mean(xf * xf, axis=-1, keepdims=True)
    ref = xf * jax.lax.rsqrt(var + eps) * weight
    assert out.shape == (batch, seq, d_model)
    assert out.dtype == ref.dtype
    assert jnp.allclose(out, ref, atol=1e-5, rtol=1e-5)

    print("KERNEL_OK")
</pallas_src>

<mosaic_0001>
module attributes {stable_mosaic.version = 11 : i64} {
  func.func @_t5_layernorm_kernel(%arg0: i32, %arg1: memref<16x32xf32, #tpu.memory_space<vmem>>, %arg2: memref<1x32xf32, #tpu.memory_space<vmem>>, %arg3: memref<16x32xf32, #tpu.memory_space<vmem>>) attributes {dimension_semantics = [#tpu.dimension_semantics<parallel>], iteration_bounds = array<i64: 1>, scalar_prefetch = 0 : i64, scratch_operands = 0 : i64, tpu.core_type = #tpu.core_type<tc>, window_params = [{transform_indices = @transform_0, window_bounds = array<i64: 16, 32>}, {pipeline_mode = #tpu.pipeline_mode<synchronous>, transform_indices = @transform_1, window_bounds = array<i64: 1, 32>}, {transform_indices = @transform_2, window_bounds = array<i64: 16, 32>}]} {
    %c0 = arith.constant 0 : index
    %c0_0 = arith.constant 0 : index
    %0 = vector.load %arg1[%c0, %c0_0] : memref<16x32xf32, #tpu.memory_space<vmem>>, vector<16x32xf32>
    %1 = arith.mulf %0, %0 : vector<16x32xf32>
    %cst = arith.constant dense<0.000000e+00> : vector<16xf32>
    %2 = vector.multi_reduction <add>, %1, %cst [1] : vector<16x32xf32> to vector<16xf32>
    %3 = vector.shape_cast %2 : vector<16xf32> to vector<16x1xf32>
    %cst_1 = arith.constant 3.200000e+01 : f32
    %4 = vector.broadcast %cst_1 : f32 to vector<16x1xf32>
    %5 = arith.divf %3, %4 : vector<16x1xf32>
    %cst_2 = arith.constant 9.99999997E-7 : f32
    %6 = vector.broadcast %cst_2 : f32 to vector<16x1xf32>
    %7 = arith.addf %5, %6 : vector<16x1xf32>
    %8 = math.rsqrt %7 : vector<16x1xf32>
    %9 = vector.broadcast %8 : vector<16x1xf32> to vector<16x32xf32>
    %10 = arith.mulf %0, %9 : vector<16x32xf32>
    %c0_3 = arith.constant 0 : index
    %c0_4 = arith.constant 0 : index
    %11 = vector.load %arg2[%c0_3, %c0_4] : memref<1x32xf32, #tpu.memory_space<vmem>>, vector<1x32xf32>
    %12 = vector.broadcast %11 : vector<1x32xf32> to vector<16x32xf32>
    %13 = arith.mulf %10, %12 : vector<16x32xf32>
    %c0_5 = arith.constant 0 : index
    %c0_6 = arith.constant 0 : index
    %14 = vector.load %arg3[%c0_5, %c0_6] : memref<16x32xf32, #tpu.memory_space<vmem>>, vector<16x32xf32>
    tpu.vector_store %arg3[%c0_5, %c0_6], %13 {strides = array<i32>} : memref<16x32xf32, #tpu.memory_space<vmem>>, vector<16x32xf32>,
    return
  }
  func.func @transform_0(%arg0: i32) -> (i32, i32) {
    %c0_i32 = arith.constant 0 : i32
    %c0_i32_0 = arith.constant 0 : i32
    return %arg0, %c0_i32 : i32, i32
  }
  func.func @transform_1(%arg0: i32) -> (i32, i32) {
    %c0_i32 = arith.constant 0 : i32
    %c0_i32_0 = arith.constant 0 : i32
    %c0_i32_1 = arith.constant 0 : i32
    return %c0_i32, %c0_i32_0 : i32, i32
  }
  func.func @transform_2(%arg0: i32) -> (i32, i32) {
    %c0_i32 = arith.constant 0 : i32
    %c0_i32_0 = arith.constant 0 : i32
    return %arg0, %c0_i32 : i32, i32
  }
}

</mosaic_0001>

<bundles_post_ra>
// kernel: tpu_custom_call.1
= control target key start
LH: loop header
LB: loop body
LE: loop exit
PB: predicated region body
PF: predicated region fallthrough
CT: control target
= control target key end

     0   :  { %7 = vsyncpa [#allocation3], 0  ;;  %s245_s0 = inlined_call_operand.hbm [shape: f32[16,32], index: 0, kind: input, shape index: {}]   ;;  %s246_s1 = inlined_call_operand.hbm [shape: f32[1,32], index: 1, kind: input, shape index: {}]   ;;  %s247_s2 = inlined_call_operand.hbm [shape: f32[16,32], index: 2, kind: output, shape index: {}]  }
   0x1   :  { %8 = vsyncpa [#allocation6], 0 }
   0x2   :  { %9 = vsyncpa [#allocation4], 0  ;;  %s14_s11 = sshll.u32 %s245_s0, 4  ;;  %s205_s12 = smov [#allocation2]   ;;  %s15_s11 = int_to_ptr.hbm [resolvable:$true] %s14_s11 }
   0x3   :  { %s16_s13 = sshll.u32 %s205_s12, 4  ;;  %s28_s16 = sshll.u32 %s246_s1, 4  ;;  %s17_s13 = int_to_ptr.vmem [resolvable:$true] %s16_s13  ;;  %s29_s16 = int_to_ptr.hbm [resolvable:$true] %s28_s16 }
   0x4   :  { %s206_s17 = smov 128   ;;  %s207_s18 = smov 8  }
   0x5   :  { %22 = dma.hbm_to_vmem [thread:$0]  %s15_s11, 256, %s17_s13, [#allocation3], %s206_s17, %s206_s17, %s207_s18  }
   0x6   :  { %s208_s19 = smov [#allocation5]  }
   0x7   :  { %s30_s20 = sshll.u32 %s208_s19, 4  ;;  %s31_s20 = int_to_ptr.vmem [resolvable:$true] %s30_s20 }
   0x8   :  { %33 = dma.hbm_to_vmem [thread:$0]  %s29_s16, 16, %s31_s20, [#allocation6]  }
   0x9   :  { %199 = dma.done.wait [#allocation3], 256  }
   0xa   :  { %200 = vsyncadd [#allocation3], 4294967040 }
   0xb   :  { %201 = dma.done.wait [#allocation6], 16  }
   0xc   :  { %202 = vsyncadd [#allocation6], 4294967280  ;;  %v42_v0 = vld [vmem:[#allocation2] sm:$0xff]  ;;  %vm46_vm0 = vcmask 261120   ;;  %v43_v2 = vld [vmem:[#allocation2 + $0x8] sm:$0xff]  ;;  %v209_v6 = vmov 32.0  }
   0xd   :  { %v44_v1 = vmul.f32 %v42_v0, %v42_v0  ;;  %v45_v4 = vmul.f32 %v43_v2, %v43_v2  ;;  %121 = vrcp.f32 %v209_v6  ;;  %v120_v27 = vld [vmem:[#allocation5] ss:$0 sm:$0xff]  ;;  %s210_s0 = smov [#allocation7]   ;;  %s100_s23 = sshll.u32 %s247_s2, 4  ;;  %s101_s23 = int_to_ptr.hbm [resolvable:$true] %s100_s23 }
   0xe   :  { %s98_s1 = sshll.u32 %s210_s0, 4  ;;  %s99_s1 = int_to_ptr.vmem [resolvable:$true] %s98_s1 }
   0xf   :  { %v47_v3 = vsel %vm46_vm0, %v44_v1, 0.0  ;;  %v50_v5 = vsel %vm46_vm0, %v45_v4, 0.0 }
  0x10   :  { %48 = vadd.xlane.f32.xlu0 %v47_v3 }
  0x13   :  { %v122_v7 = vpop.eup %121 }
  0x14   :  { %v54_v8 = vmul.f32 32.0, %v122_v7  ;;  %vm58_vm1 = vweird.f32 %v122_v7 }
  0x16   :  { %v55_v9 = vsub.f32 1.0, %v54_v8 }
  0x18   :  { %51 = vadd.xlane.f32.xlu0 %v50_v5  ;;  %v56_v10 = vmul.f32 %v122_v7, %v55_v9 }
  0x1a   :  { %v57_v11 = vadd.f32 %v122_v7, %v56_v10 }
  0x1c   :  { %v59_v12 = vsel %vm58_vm1, %v122_v7, %v57_v11 }
  0x83   :  { %v49_v13 = vpop.xlane.xlu0 %48 }
  0x84   :  { %v60_v14 = vmul.f32 %v59_v12, %v49_v13 }
  0x86   :  { %v62_v15 = vadd.f32 1e-06, %v60_v14 }
  0x88   :  { %123 = vrsqrt.f32 %v62_v15  ;;  %vm70_vm3 = vweird.f32 %v62_v15 }
  0x8b   :  { %v52_v16 = vpop.xlane.xlu0 %51 }
  0x8c   :  { %v61_v17 = vmul.f32 %v59_v12, %v52_v16 }
  0x8e   :  { %v124_v18 = vpop.eup %123  ;;  %v63_v19 = vadd.f32 1e-06, %v61_v17 }
  0x8f   :  { %v65_v20 = vmul.f32 %v124_v18, %v62_v15  ;;  %vm71_vm2 = vweird.f32 %v124_v18 }
  0x90   :  { %125 = vrsqrt.f32 %v63_v19  ;;  %vm72_vm4 = vmor %vm70_vm3, %vm71_vm2  ;;  %vm80_vm6 = vweird.f32 %v63_v19 }
  0x91   :  { %v66_v21 = vmul.f32 %v124_v18, %v65_v20 }
  0x93   :  { %v67_v22 = vmul.f32 0.5, %v66_v21 }
  0x95   :  { %v68_v23 = vsub.f32 1.5, %v67_v22 }
  0x96   :  { %v126_v24 = vpop.eup %125 }
  0x97   :  { %v69_v25 = vmul.f32 %v124_v18, %v68_v23  ;;  %v75_v26 = vmul.f32 %v126_v24, %v63_v19  ;;  %vm81_vm5 = vweird.f32 %v126_v24 }
  0x98   :  { %vm82_vm7 = vmor %vm80_vm6, %vm81_vm5 }
  0x99   :  { %v73_v28 = vsel %vm72_vm4, %v124_v18, %v69_v25  ;;  %v76_v29 = vmul.f32 %v126_v24, %v75_v26 }
  0x9a   :  { %v84_v30 = vmul.f32 %v73_v28, %v42_v0 }
  0x9b   :  { %v77_v31 = vmul.f32 0.5, %v76_v29 }
  0x9c   :  { %v90_v32 = vmul.f32 %v120_v27, %v84_v30 }
  0x9d   :  { %v78_v33 = vsub.f32 1.5, %v77_v31 }
  0x9e   :  { %92 = vst.msk [vmem:[#allocation7] sm:$0xff] %vm46_vm0, %v90_v32 }
  0x9f   :  { %v79_v34 = vmul.f32 %v126_v24, %v78_v33 }
  0xa1   :  { %v83_v35 = vsel %vm82_vm7, %v126_v24, %v79_v34 }
  0xa2   :  { %v85_v36 = vmul.f32 %v83_v35, %v43_v2 }
  0xa4   :  { %v91_v37 = vmul.f32 %v120_v27, %v85_v36 }
  0xa6   :  { %93 = vst.msk [vmem:[#allocation7 + $0x8] sm:$0xff] %vm46_vm0, %v91_v37 }
  0xa7   :  { %106 = dma.vmem_to_hbm [thread:$0]  %s99_s1, 256, %s101_s23, [#allocation4], %s206_s17, %s206_s17, %s207_s18  }
  0xa8   :  { %203 = dma.done.wait [#allocation4], 256  }
  0xa9   :  { %204 = vsyncadd [#allocation4], 4294967040 }
  0xaa   :  { %111 = vsyncpa [#allocation3], 1 }
  0xab   :  { %112 = vsyncpa [#allocation6], 1 }
  0xac   :  { %113 = vsyncpa [#allocation4], 1 }

</bundles_post_ra>
